<compile_context>
chip_gen: v6e
topology: v6e:2x2x1
jax: 0.10.0
libtpu: 0.0.40
codegen_flags: <defaults>
</compile_context>

<pallas_src>
import jax
import jax.numpy as jnp
import numpy as np
from jax.experimental import pallas as pl
from jax.experimental.pallas import tpu as pltpu


def _fused_pointwise_kernel(x_ref, wt_ref, b_ref, o_ref):
    # x_ref : (1, C_in,  TM)   pixel tile, pixels on the lane axis
    # wt_ref: (C_out, C_in)    pre-concatenated [w1 | w2]^T
    # b_ref : (C_out, 1)       pre-concatenated bias
    # o_ref : (1, C_out, TM)
    x = x_ref[0]                                               # (C_in, TM)
    y = jnp.dot(wt_ref[...], x, preferred_element_type=jnp.float32)
    o_ref[0] = (y + b_ref[...]).astype(o_ref.dtype)            # lane-dense store


def _choose_tile(hw, max_tile=2048):
    """Largest lane-aligned tile (<= max_tile) that evenly divides hw."""
    if hw % 128 != 0:
        return hw                      # fall back: whole spatial extent as one block
    t = (min(max_tile, hw) // 128) * 128
    while hw % t != 0:
        t -= 128
    return t


def cattable_forward(x_nchw, w1, b1, w2, b2):
    """x_nchw: (B, C_in, H, W); w1: (C_in, C1); w2: (C_in, C2).

    Returns (B, C1+C2, H, W) == torch.cat((conv1x1_1(x), conv1x1_2(x)), dim=1).
    """
    B, C_in, H, W = x_nchw.shape
    C1, C2 = w1.shape[1], w2.shape[1]
    C_out = C1 + C2
    HW = H * W

    # Fuse the two 1x1 convs: single weight matrix, transposed so C_out is the
    # sublane axis and the pixel dim stays on lanes.
    wt_cat = jnp.concatenate([w1, w2], axis=1).T               # (C_out, C_in)
    b_cat = jnp.concatenate([b1, b2], axis=0).reshape(C_out, 1)  # (C_out, 1)

    # NCHW -> (B, C_in, H*W): free reshape, no transpose needed.
    x_mat = x_nchw.reshape(B, C_in, HW)

    TM = _choose_tile(HW)
    grid = (B, pl.cdiv(HW, TM))

    itemsize = jnp.dtype(x_nchw.dtype).itemsize
    cost = pl.CostEstimate(
        flops=2 * B * HW * C_in * C_out,
        transcendentals=0,
        bytes_accessed=itemsize * (B * HW * C_in + B * HW * C_out)
        + 4 * (C_in * C_out + C_out),
    )

    out = pl.pallas_call(
        _fused_pointwise_kernel,
        out_shape=jax.ShapeDtypeStruct((B, C_out, HW), x_nchw.dtype),
        grid=grid,
        in_specs=[
            pl.BlockSpec((1, C_in, TM), lambda b, m: (b, 0, m)),
            pl.BlockSpec((C_out, C_in), lambda b, m: (0, 0)),
            pl.BlockSpec((C_out, 1), lambda b, m: (0, 0)),
        ],
        out_specs=pl.BlockSpec((1, C_out, TM), lambda b, m: (b, 0, m)),
        compiler_params=pltpu.CompilerParams(
            dimension_semantics=("parallel", "parallel"),
            vmem_limit_bytes=32 * 1024 * 1024,
        ),
        cost_estimate=cost,
    )(x_mat, wt_cat, b_cat)

    # (B, C_out, H*W) -> NCHW: free reshape.
    return out.reshape(B, C_out, H, W)


if __name__ == "__main__":
    # Small shapes consistent with the module's forward (NCHW conv input).
    B, C_in, H, W = 2, 4, 16, 16
    C1, C2 = 8, 8

    key = jax.random.PRNGKey(0)
    kx, kw1, kb1, kw2, kb2 = jax.random.split(key, 5)

    x = jax.random.normal(kx, (B, C_in, H, W), dtype=jnp.float32)
    # Deterministic synthetic parameters for m1 / m2 (1x1 convs).
    w1 = jax.random.normal(kw1, (C_in, C1), dtype=jnp.float32) * 0.1
    b1 = jax.random.normal(kb1, (C1,), dtype=jnp.float32) * 0.1
    w2 = jax.random.normal(kw2, (C_in, C2), dtype=jnp.float32) * 0.1
    b2 = jax.random.normal(kb2, (C2,), dtype=jnp.float32) * 0.1

    y = cattable_forward(x, w1, b1, w2, b2)
    y = jax.block_until_ready(y)

    # Pure-JAX reference of  th.cat((m1(x), m2(x)), 1)  with 1x1 convs.
    x_nhwc = jnp.transpose(x, (0, 2, 3, 1))
    r1 = jnp.einsum("bhwc,cd->bhwd", x_nhwc, w1) + b1
    r2 = jnp.einsum("bhwc,cd->bhwd", x_nhwc, w2) + b2
    ref = jnp.transpose(jnp.concatenate([r1, r2], axis=-1), (0, 3, 1, 2))

    assert y.shape == (B, C1 + C2, H, W)
    np.testing.assert_allclose(np.asarray(y), np.asarray(ref), rtol=1e-5, atol=1e-5)
    print("KERNEL_OK")
</pallas_src>

<mosaic_0001>
module attributes {stable_mosaic.version = 11 : i64} {
  func.func @_fused_pointwise_kernel(%arg0: i32, %arg1: i32, %arg2: memref<1x4x256xf32, #tpu.memory_space<vmem>>, %arg3: memref<16x4xf32, #tpu.memory_space<vmem>>, %arg4: memref<16x1xf32, #tpu.memory_space<vmem>>, %arg5: memref<1x16x256xf32, #tpu.memory_space<vmem>>) attributes {dimension_semantics = [#tpu.dimension_semantics<parallel>, #tpu.dimension_semantics<parallel>], iteration_bounds = array<i64: 2, 1>, scalar_prefetch = 0 : i64, scratch_operands = 0 : i64, tpu.core_type = #tpu.core_type<tc>, window_params = [{transform_indices = @transform_0, window_bounds = array<i64: 1, 4, 256>}, {pipeline_mode = #tpu.pipeline_mode<synchronous>, transform_indices = @transform_1, window_bounds = array<i64: 16, 4>}, {pipeline_mode = #tpu.pipeline_mode<synchronous>, transform_indices = @transform_2, window_bounds = array<i64: 16, 1>}, {transform_indices = @transform_3, window_bounds = array<i64: 1, 16, 256>}]} {
    %c0 = arith.constant 0 : index
    %c0_0 = arith.constant 0 : index
    %c0_1 = arith.constant 0 : index
    %0 = vector.load %arg2[%c0, %c0_0, %c0_1] : memref<1x4x256xf32, #tpu.memory_space<vmem>>, vector<1x4x256xf32>
    %1 = vector.shape_cast %0 : vector<1x4x256xf32> to vector<4x256xf32>
    %c0_2 = arith.constant 0 : index
    %c0_3 = arith.constant 0 : index
    %2 = vector.load %arg3[%c0_2, %c0_3] : memref<16x4xf32, #tpu.memory_space<vmem>>, vector<16x4xf32>
    %cst = arith.constant dense<0.000000e+00> : vector<16x256xf32>
    %3 = tpu.matmul %2, %1, %cst {dimension_numbers = #tpu.dot_dimension_numbers<[1], [0], [0], [1], [0, 0, 1, 1], [], []>} : vector<16x4xf32>, vector<4x256xf32>, vector<16x256xf32> -> vector<16x256xf32>
    %c0_4 = arith.constant 0 : index
    %c0_5 = arith.constant 0 : index
    %4 = vector.load %arg4[%c0_4, %c0_5] : memref<16x1xf32, #tpu.memory_space<vmem>>, vector<16x1xf32>
    %5 = vector.broadcast %4 : vector<16x1xf32> to vector<16x256xf32>
    %6 = arith.addf %3, %5 : vector<16x256xf32>
    %c0_6 = arith.constant 0 : index
    %c0_7 = arith.constant 0 : index
    %c0_8 = arith.constant 0 : index
    %7 = vector.load %arg5[%c0_6, %c0_7, %c0_8] : memref<1x16x256xf32, #tpu.memory_space<vmem>>, vector<1x16x256xf32>
    %8 = vector.shape_cast %7 : vector<1x16x256xf32> to vector<16x256xf32>
    %9 = vector.shape_cast %6 : vector<16x256xf32> to vector<1x16x256xf32>
    tpu.vector_store %arg5[%c0_6, %c0_7, %c0_8], %9 {strides = array<i32>} : memref<1x16x256xf32, #tpu.memory_space<vmem>>, vector<1x16x256xf32>,
    return
  }
  func.func @transform_0(%arg0: i32, %arg1: i32) -> (i32, i32, i32) {
    %c0_i32 = arith.constant 0 : i32
    %c0_i32_0 = arith.constant 0 : i32
    return %arg0, %c0_i32, %arg1 : i32, i32, i32
  }
  func.func @transform_1(%arg0: i32, %arg1: i32) -> (i32, i32) {
    %c0_i32 = arith.constant 0 : i32
    %c0_i32_0 = arith.constant 0 : i32
    %c0_i32_1 = arith.constant 0 : i32
    return %c0_i32, %c0_i32_0 : i32, i32
  }
  func.func @transform_2(%arg0: i32, %arg1: i32) -> (i32, i32) {
    %c0_i32 = arith.constant 0 : i32
    %c0_i32_0 = arith.constant 0 : i32
    %c0_i32_1 = arith.constant 0 : i32
    return %c0_i32, %c0_i32_0 : i32, i32
  }
  func.func @transform_3(%arg0: i32, %arg1: i32) -> (i32, i32, i32) {
    %c0_i32 = arith.constant 0 : i32
    %c0_i32_0 = arith.constant 0 : i32
    return %arg0, %c0_i32, %arg1 : i32, i32, i32
  }
}

</mosaic_0001>

<bundles_post_ra>
// kernel: tpu_custom_call.1
= control target key start
LH: loop header
LB: loop body
LE: loop exit
PB: predicated region body
PF: predicated region fallthrough
CT: control target
= control target key end

     0   :  { %8 = vsyncpa [#allocation3], 0  ;;  %s716_s0 = inlined_call_operand.vmem [shape: f32[2,4,256], index: 0, kind: input, shape index: {}]   ;;  %s717_s1 = inlined_call_operand.vmem [shape: f32[16,4], index: 1, kind: input, shape index: {}]   ;;  %s718_s2 = inlined_call_operand.vmem [shape: f32[16,1], index: 2, kind: input, shape index: {}]   ;;  %s719_s3 = inlined_call_operand.hbm [shape: f32[2,16,256], index: 3, kind: output, shape index: {}]  }
   0x1   :  { %10 = vsyncpa [#allocation3 + $0x1], 0  ;;  %s590_s12 = smov 0   ;;  %s592_s13 = smov 0  }
   0x2   :  { %s594_s14 = smov 0   ;;  %s596_s15 = smov 0  }
   0x3   :  { %s598_s16 = smov 0   ;;  %s600_s17 = smov 0  }
   0x4 LB: > { %s405_s18 = sadd.s32 4294967295, %s563_s17   ;;  %s406_s19 = sadd.s32 4294967294, %s563_s17   ;;  %s563_s17 = sphi %s600_s17, %s16_s17   ;;  %s559_s16 = sphi %s598_s16, %s726_s16   ;;  %s555_s15 = sphi %s596_s15, %s725_s15   ;;  %s551_s14 = sphi %s594_s14, %s724_s14   ;;  %s547_s13 = sphi %s592_s13, %s723_s13   ;;  %s543_s12 = sphi %s590_s12, %s722_s12  }
   0x5   : > { %s28_s20 = sadd.s32 1, %s559_s16  ;;  %s107_s21 = sadd.s32 1, %s551_s14 }
   0x6   : > { %p30_p0 = scmp.ge.s32.totalorder %s28_s20, 2  ;;  %p117_p1 = scmp.ne.s32.totalorder %s551_s14, %s547_s13 }
   0x7   : > { %p118_p2 = scmp.eq.s32.totalorder %s405_s18, 1  ;;  %p123_p3 = scmp.ne.s32.totalorder %s547_s13, %s543_s12 }
   0x8   : > { %s728_s20 = smov (%p30_p0, %s28_s20), 0  ;;  %p124_p5 = scmp.eq.s32.totalorder %s406_s19, 1 }
   0x9   : > { %p630_p4 = por %p118_p2, %p117_p1  ;;  %s102_s23 = ssub.s32 %s559_s16, %s728_s20 }
   0xa   : > { %p409_p6 = scmp.ge.s32.totalorder %s563_s17, 1  ;;  %p105_p7 = scmp.eq.s32.totalorder %s102_s23, 0 }
   0xb   : > { %p637_p8 = por %p124_p5, %p123_p3  ;;  %p161_p9 = scmp.lt.s32.totalorder %s563_s17, 3 }
   0xc   : > { %s643_s25 = scalar_select %p105_p7, %s551_s14, %s107_s21  }
   0xd   : > { %p162_p10 = pnand %p409_p6, %p161_p9 }
   0xe   : > { %p190_p11 = scmp.lt.s32.totalorder (!%p162_p10), %s555_s15, 1  ;;  %s186_s18 = sand.u32 (!%p162_p10), 1, %s547_s13  }
   0xf   : > { %165 = sbr.rel (%p162_p10) target bundleno = 241 (0xf1), region = 32  ;;  %s410_s19 = sshll.u32 (!%p162_p10), %s186_s18, 5 }
  0x10   : > { %s188_s21 = scalar_lea.vmem (!%p162_p10), [#allocation2], %s410_s19  ;;  %s423_s26 = sshll.u32 (!%p162_p10), %s555_s15, 9 }
  0x11   : > { %s326_s23 = sshll.u32 (!%p162_p10), %s188_s21, 4  ;;  %s567_s4 = smov (!%p162_p10), [#allocation2]   ;;  %s664_s23 = int_to_ptr.vmem [resolvable:$true] %s326_s23 }
  0x12   : > { %s487_s30 = scalar_lea.vmem (!%p162_p10), %s664_s23, 512  ;;  %s491_s5 = sshll.u32 (!%p162_p10), %s567_s4, 4  ;;  %s492_s5 = int_to_ptr.vmem [resolvable:$false] %s491_s5 }
  0x13   : > { %p488_p12 = scmp.ne.s32.totalorder (!%p162_p10), %s664_s23, %s487_s30  ;;  %s493_s6 = scalar_lea.vmem (!%p162_p10), %s492_s5, 1024 }
  0x14   : > { %v565_v0 = vmov 0.0   ;;  %v203_v1 = vld [vmem:[%s718_s2] sm:$0xff]  ;;  %s191_s28 = scalar_select %p190_p11, %s555_s15, 1  ;;  %v566_v2 = vmov 0   ;;  %v204_v3 = vld [vmem:[%s718_s2 + $0x8] sm:$0xff]  ;;  %vm224_vm0 = vcmask 1043456  }
  0x15   : > { %293 = vmatprep.mubr.f32.mxu0 %v565_v0  ;;  %299 = vmatprep.mubr.f32.mxu1 %v565_v0  ;;  %v201_v6 = vld [vmem:[%s717_s1] sm:$0xff]  ;;  %vm217_vm1 = vcmask 31744   ;;  %v202_v7 = vld [vmem:[%s717_s1 + $0x8] sm:$0xff]  ;;  %s671_s15 = scalar_lea.sflag [#allocation3], %s186_s18  ;;  %p489_p13 = pnand %p488_p12, %p630_p4 }
  0x16   : > { %485 = vset.pattern.permute.xlu0 %v566_v2  ;;  %s422_s29 = sshll.u32 %s191_s28, 3  ;;  %p494_p1 = scmp.lt.s32.totalorder %s664_s23, %s492_s5 }
  0x17   : > { %207 = vperm.xlu0 %485, %v203_v1   ;;  %s197_s7 = scalar_lea.vmem %s716_s0, %s422_s29  ;;  %s669_s29 = scalar_lea.hbm %s719_s3, %s423_s26 }
  0x18   : > { %v200_v4 = vld [vmem:[%s197_s7] sm:$0xff]  ;;  %p490_p0 = pneg %p489_p13  ;;  %p495_p2 = scmp.lt.s32.totalorder %s493_s6, %s487_s30 }
  0x19   : > { %v216_v5 = vcombine.high %v200_v4, %v200_v4 }
  0x1a   : > { %p496_p3 = por %p495_p2, %p494_p1 }
  0x1b   : > { %212 = vperm.xlu0 %485, %v204_v3   ;;  %413 = vmatprep.subr.msk.mxu0 %vm224_vm0, %v216_v5 }
  0x1c   : > { %424 = vmatprep.subr.msk.mxu1 %vm224_vm0, %v216_v5  ;;  %414 = vmatpush1.msk.msra.mxu0 %vm224_vm0, %v200_v4  ;;  %p497_p5 = pnand %p496_p3, %p490_p0 }
  0x1d   : > { %425 = vmatpush1.msk.msra.mxu1 %vm224_vm0, %v200_v4  ;;  %415 = vmatmul.mubr.msk.f32.vlgmr.msra.gmra.mxu0 %vm217_vm1, %v201_v6 }
  0x1e   : > { %416 = vmatmul.mubr.msk.f32.vlgmr.msra.gmra.mxu1 %vm217_vm1, %v202_v7 }
  0x92   : > { %v208_v8 = vpop.permute.xlu0 %207 }
  0x96   : > { %v213_v9 = vpop.permute.xlu0 %212 }
  0xdd   : > { %v295_v10 = vpop.f32.mrf.mxu0 }
  0xde   : > { %v301_v11 = vpop.f32.mrf.mxu1  ;;  %v296_v12 = vadd.f32 %v295_v10, %v208_v8 }
  0xdf   : > { %v302_v13 = vadd.f32 %v301_v11, %v213_v9  ;;  %v297_v14 = vpop.f32.mrf.mxu0 }
  0xe0   : > { %v303_v15 = vpop.f32.mrf.mxu1  ;;  %306 = vst [vmem:[%s188_s21] sm:$0xff] %v296_v12  ;;  %v298_v16 = vadd.f32 %v297_v14, %v208_v8 }
  0xe1   : > { %308 = vst [vmem:[%s188_s21 + $0x10] sm:$0xff] %v302_v13  ;;  %v304_v17 = vadd.f32 %v303_v15, %v213_v9 }
  0xe2   : > { %307 = vst [vmem:[%s188_s21 + $0x8] sm:$0xff] %v298_v16 }
  0xe3   : > { %309 = vst [vmem:[%s188_s21 + $0x18] sm:$0xff] %v304_v17 }
  0xe4   : > { %500 = shalt.err (!%p497_p5)
}
  0xe5   : > { %s501_s7 = scalar_lea.hbm %s669_s29, 512  ;;  %s505_s10 = scalar_lea.hbm %s719_s3, 1024 }
  0xe6   : > { %p502_p6 = scmp.ne.s32.totalorder %s669_s29, %s501_s7  ;;  %p506_p10 = scmp.lt.s32.totalorder %s669_s29, %s719_s3 }
  0xe7   : > { %p507_p11 = scmp.lt.s32.totalorder %s505_s10, %s501_s7 }
  0xe8   : > { %p503_p7 = pnand %p502_p6, %p630_p4 }
  0xe9   : > { %p508_p12 = por %p507_p11, %p506_p10 }
  0xea   : > { %p504_p9 = pneg %p503_p7 }
  0xec   : > { %p509_p13 = pnand %p508_p12, %p504_p9 }
  0xee   : > { %512 = shalt.err (!%p509_p13)
}
  0xef   : > { %s568_s19 = smov 256   ;;  %s569_s21 = smov 16  }
  0xf0   : > { %426 = dma.vmem_to_hbm [thread:$0]  (%p630_p4), %s664_s23, 512, %s669_s29, %s671_s15, %s568_s19, %s568_s19, %s569_s21  }
  0xf1 PF: > { %p432_p0 = scmp.ge.s32.totalorder %s563_s17, 2  ;;  %s341_s26 = sand.u32 1, %s543_s12  }
  0xf2   : > { %s342_s27 = scalar_lea.sflag [#allocation3], %s341_s26 }
  0xf3   : > { %p429_p1 = pnand %p432_p0, %p637_p8 }
  0xf5   : > { %p430_p2 = pneg %p429_p1 }
  0xf7   : > { %538 = dma.done.wait (%p430_p2), %s342_s27, 512  }
  0xf8   : > { %540 = vsyncadd (%p430_p2), %s342_s27, 4294966784  ;;  %s16_s17 = sadd.s32 1, %s563_s17   ;;  %s722_s12 = smov %s547_s13 }
  0xf9   : > { %p13_p3 = scmp.ge.s32.totalorder %s16_s17, 4   ;;  %s723_s13 = smov %s551_s14 }
  0xfa   : > { %s724_s14 = smov %s643_s25  ;;  %s725_s15 = smov %s559_s16 }
  0xfb   : > { %s726_s16 = smov %s728_s20  ;;  %15 = sbr.rel (!%p13_p3) target bundleno = 4 (0x4), region = 67 }
 0x100   :  { %347 = vsyncpa [#allocation3], 1 }
 0x101   :  { %349 = vsyncpa [#allocation3 + $0x1], 1 }

</bundles_post_ra>
